<compile_context>
chip_gen: v7x
topology: tpu7x:2x2x1
jax: 0.10.0
libtpu: 0.0.40
codegen_flags: <defaults>
</compile_context>

<pallas_src>
import functools

import jax
import jax.numpy as jnp
from jax import lax
from jax.experimental import pallas as pl
from jax.experimental.pallas import tpu as pltpu


_BN_EPS = 1e-5
_SQRT_2_OVER_PI = 0.7978845608028654
_LANE = 128          # lane width: all feature dims are zero-padded to this
_NEG_INF = -1e9      # sentinel for padded class lanes (log_softmax ignores them)
_NUM_LAYERS = 4


def _round_up(x, m):
    return (x + m - 1) // m * m


def _gelu(x):
    # TODO(synk): torch F.gelu defaults to exact erf-GELU; tanh approximation
    # used here for Mosaic elementwise compatibility (max abs error ~1e-3).
    return 0.5 * x * (1.0 + jnp.tanh(_SQRT_2_OVER_PI * (x + 0.044715 * x * x * x)))


def _gcn_fused_kernel(adj_ref, x0_ref, w_ref, shift_ref, out_ref, h_ref, g_ref, *, tm):
    """Fused 4-layer GCN.  Grid = (layer, row_tile), iterated sequentially.

    adj_ref   : (tm, N_pad)       bf16  streamed row tile of normalized adjacency
    x0_ref    : (N_pad, 128)      bf16  padded input features (VMEM resident)
    w_ref     : (4, 128, 128)     bf16  per-layer weights (BN scale folded in)
    shift_ref : (4, 1, 128)       f32   per-layer folded conv-bias + BN shift
    out_ref   : (tm, 128)         f32   final log_softmax rows (written at last layer)
    h_ref     : (N_pad, 128) bf16 scratch: activations of the current layer
    g_ref     : (N_pad, 128) bf16 scratch: G = H_prev @ W_layer (aggregation RHS)
    """
    layer = pl.program_id(0)
    i = pl.program_id(1)
    last_layer = pl.num_programs(0) - 1

    # Once per layer (first row tile): transform the resident activations with
    # this layer's folded weight.  Hoisting this out of the per-tile path keeps
    # the streamed work to a single A_rows @ G matmul (no dependent second
    # matmul / f32->bf16 recast on the per-tile critical path).
    @pl.when(i == 0)
    def _():
        w = w_ref[layer]                                       # (128, 128) bf16

        @pl.when(layer == 0)
        def _():
            g_ref[...] = jnp.dot(
                x0_ref[...], w, preferred_element_type=jnp.float32
            ).astype(jnp.bfloat16)

        @pl.when(layer > 0)
        def _():
            g_ref[...] = jnp.dot(
                h_ref[...], w, preferred_element_type=jnp.float32
            ).astype(jnp.bfloat16)

    # Neighbour aggregation for this row tile: (tm, N_pad) @ (N_pad, 128),
    # bf16 MXU feed with f32 accumulation.
    y = jnp.dot(adj_ref[...], g_ref[...], preferred_element_type=jnp.float32)
    y = y + shift_ref[layer]                                   # folded bias / BN (f32)

    @pl.when(layer < last_layer)
    def _():
        row0 = pl.multiple_of(i * tm, tm)
        h_ref[pl.ds(row0, tm), :] = _gelu(y).astype(jnp.bfloat16)

    @pl.when(layer == last_layer)
    def _():
        # log_softmax in f32; padded class lanes carry -1e9 so they contribute ~0.
        m = jnp.max(y, axis=-1, keepdims=True)
        z = y - m
        lse = jnp.log(jnp.sum(jnp.exp(z), axis=-1, keepdims=True))
        out_ref[...] = z - lse


def _fold_layer_params(w, b, bn=None, *, pad_shift_value=0.0):
    """Fold conv bias (+ eval-mode BatchNorm) into one (W_scaled, shift) pair.

    BN(y) = (y - mean) * gamma / sqrt(var + eps) + beta with y = A(XW) + b
          = A X (W * s) + ((b - mean) * s + beta),   s = gamma * rsqrt(var + eps)

    Pads to the 128-lane width: padded W entries are zero; padded shift lanes are
    `pad_shift_value` (0 for hidden layers so padded lanes stay exactly 0 through
    GELU, -1e9 for the class layer so log_softmax ignores them).
    """
    fin, fout = w.shape
    if bn is not None:
        gamma, beta, mean, var = bn
        s = gamma * lax.rsqrt(var + _BN_EPS)          # (1, fout)
        w = w * s                                     # column-wise scale fold
        shift = (b - mean) * s + beta                 # (1, fout)
    else:
        shift = b
    w_pad = jnp.zeros((_LANE, _LANE), jnp.float32).at[:fin, :fout].set(w)
    shift_pad = jnp.full((1, _LANE), pad_shift_value, jnp.float32).at[:, :fout].set(shift)
    return w_pad.astype(jnp.bfloat16), shift_pad


def _pick_tm(n_pad):
    # Fill the 256-wide MXU on v6e/v7x when the graph is big enough; n_pad is
    # always a multiple of 128 so 128 is a safe fallback (fills v5e's 128 MXU).
    return 256 if n_pad % 256 == 0 else 128


def gcn_forward(adj_norm, x, params, num_classes):
    """adj_norm: (N, N) f32 normalized adjacency; x: (N, F0) f32; params: flat list."""
    n, f0 = x.shape
    assert f0 <= _LANE and num_classes <= _LANE
    n_pad = _round_up(n, _LANE)
    tm = _pick_tm(n_pad)
    n_tiles = n_pad // tm

    # Zero-padded rows/columns are exact no-ops for the aggregation.
    adj_p = jnp.zeros((n_pad, n_pad), jnp.float32).at[:n, :n].set(adj_norm)
    adj_p = adj_p.astype(jnp.bfloat16)   # halves the dominant HBM stream (inference-grade)
    x0 = jnp.zeros((n_pad, _LANE), jnp.float32).at[:n, :f0].set(x).astype(jnp.bfloat16)

    (w1, b1, g1, be1, m1, v1,
     w2, b2, g2, be2, m2, v2,
     w3, b3, g3, be3, m3, v3,
     w4, b4) = params

    folded = [
        _fold_layer_params(w1, b1, (g1, be1, m1, v1)),
        _fold_layer_params(w2, b2, (g2, be2, m2, v2)),
        _fold_layer_params(w3, b3, (g3, be3, m3, v3)),
        # TODO(synk): Dropout(p=0.5) before conv4 is identity in eval mode;
        # training-mode dropout mask not implemented.
        _fold_layer_params(w4, b4, None, pad_shift_value=_NEG_INF),
    ]
    w_stack = jnp.stack([wp for wp, _ in folded])          # (4, 128, 128) bf16
    shift_stack = jnp.stack([sp for _, sp in folded])      # (4, 1, 128)   f32

    # Explicit VMEM budget sized from the actual block footprint (review: v5e's
    # scoped default is ~16 MiB), kept under the physical ceiling with headroom.
    est = (2 * tm * n_pad * 2                 # adjacency row tile, 2 pipeline buffers (bf16)
           + 2 * n_pad * _LANE * 2            # resident x0 (bf16)
           + 2 * _NUM_LAYERS * _LANE * _LANE * 2   # resident weights (bf16)
           + 2 * _NUM_LAYERS * 8 * _LANE * 4       # resident shifts (sublane-padded f32)
           + 2 * tm * _LANE * 4               # output tile (f32)
           + 2 * n_pad * _LANE * 2)           # H + G scratch (bf16)
    try:
        vmem_cap = pltpu.get_tpu_info().vmem_capacity_bytes
    except Exception:
        vmem_cap = 64 << 20                   # conservative (v7x per-TC VMEM)
    vmem_limit = int(min(max(2 * est + (2 << 20), 32 << 20), vmem_cap - (8 << 20)))

    kernel = functools.partial(_gcn_fused_kernel, tm=tm)
    out = pl.pallas_call(
        kernel,
        out_shape=jax.ShapeDtypeStruct((n_pad, _LANE), jnp.float32),
        grid=(_NUM_LAYERS, n_tiles),
        in_specs=[
            pl.BlockSpec((tm, n_pad), lambda l, i: (i, 0)),                    # A row tile (streamed)
            pl.BlockSpec((n_pad, _LANE), lambda l, i: (0, 0)),                 # x0 (resident)
            pl.BlockSpec((_NUM_LAYERS, _LANE, _LANE), lambda l, i: (0, 0, 0)), # weights (resident)
            pl.BlockSpec((_NUM_LAYERS, 1, _LANE), lambda l, i: (0, 0, 0)),     # shifts (resident)
        ],
        # Output rows are only produced at the last layer; keep the block index
        # pinned to 0 before that so no intermediate writebacks are issued.
        out_specs=pl.BlockSpec(
            (tm, _LANE),
            lambda l, i: (jnp.where(l == _NUM_LAYERS - 1, i, 0), 0)),
        scratch_shapes=[
            pltpu.VMEM((n_pad, _LANE), jnp.bfloat16),   # H (current-layer activations)
            pltpu.VMEM((n_pad, _LANE), jnp.bfloat16),   # G = H_prev @ W_layer
        ],
        compiler_params=pltpu.CompilerParams(
            dimension_semantics=("arbitrary", "arbitrary"),
            vmem_limit_bytes=vmem_limit),
    )(adj_p, x0, w_stack, shift_stack)

    return out[:n, :num_classes]


def normalized_adjacency(edge_index, num_nodes):
    """Dense  D^{-1/2} (A + I) D^{-1/2}  from a (2, E) int edge_index (plain-JAX glue)."""
    src, dst = edge_index[0], edge_index[1]
    a = jnp.zeros((num_nodes, num_nodes), jnp.float32)
    a = a.at[src, dst].set(1.0)
    # Add only *missing* self-loops (matches PyG gcn_norm's add_remaining_self_loops).
    a = jnp.maximum(a, jnp.eye(num_nodes, dtype=jnp.float32))
    deg = jnp.sum(a, axis=1)
    d_inv_sqrt = jnp.where(deg > 0, lax.rsqrt(deg), 0.0)
    return d_inv_sqrt[:, None] * a * d_inv_sqrt[None, :]


def init_params(key, num_node_features, num_classes):
    """Deterministic synthetic parameters matching the module's __init__ shapes."""
    dims = [num_node_features, 16, 32, 64, num_classes]
    params = []
    keys = jax.random.split(key, 24)
    ki = 0
    for layer in range(4):
        fin, fout = dims[layer], dims[layer + 1]
        w = 0.2 * jax.random.normal(keys[ki], (fin, fout), jnp.float32); ki += 1
        b = 0.05 * jax.random.normal(keys[ki], (1, fout), jnp.float32); ki += 1
        params += [w, b]
        if layer < 3:  # bn1/bn2/bn3 (eval-mode running stats)
            gamma = 1.0 + 0.1 * jax.random.normal(keys[ki], (1, fout), jnp.float32); ki += 1
            beta = 0.05 * jax.random.normal(keys[ki], (1, fout), jnp.float32); ki += 1
            mean = 0.1 * jax.random.normal(keys[ki], (1, fout), jnp.float32); ki += 1
            var = 0.5 + jnp.abs(0.5 * jax.random.normal(keys[ki], (1, fout), jnp.float32)); ki += 1
            params += [gamma, beta, mean, var]
    return params


if __name__ == "__main__":
    N = 64                   # number of graph nodes
    NUM_NODE_FEATURES = 4
    NUM_CLASSES = 8

    key = jax.random.PRNGKey(0)
    k_x, k_p = jax.random.split(key)

    # Node features (N, F0)
    x = jax.random.normal(k_x, (N, NUM_NODE_FEATURES), jnp.float32)

    # Synthetic ring graph edge_index (2, E), both directions.
    idx = jnp.arange(N)
    src = jnp.concatenate([idx, (idx + 1) % N])
    dst = jnp.concatenate([(idx + 1) % N, idx])
    edge_index = jnp.stack([src, dst], axis=0)

    adj_norm = normalized_adjacency(edge_index, N)
    params = init_params(k_p, NUM_NODE_FEATURES, NUM_CLASSES)

    out = gcn_forward(adj_norm, x, params, NUM_CLASSES)
    out = jax.block_until_ready(out)

    assert out.shape == (N, NUM_CLASSES)
    # rows of log_softmax must exponentiate-sum to 1
    assert jnp.allclose(jnp.sum(jnp.exp(out), axis=1), 1.0, atol=1e-3)
    assert bool(jnp.all(jnp.isfinite(out)))
    print("KERNEL_OK")
</pallas_src>

<mosaic_0001>
module attributes {stable_mosaic.version = 11 : i64} {
  func.func @_gcn_fused_kernel(%arg0: i32, %arg1: i32, %arg2: memref<128x128xbf16, #tpu.memory_space<vmem>>, %arg3: memref<128x128xbf16, #tpu.memory_space<vmem>>, %arg4: memref<4x128x128xbf16, #tpu.memory_space<vmem>>, %arg5: memref<4x1x128xf32, #tpu.memory_space<vmem>>, %arg6: memref<128x128xf32, #tpu.memory_space<vmem>>, %arg7: memref<128x128xbf16, #tpu.memory_space<vmem>>, %arg8: memref<128x128xbf16, #tpu.memory_space<vmem>>) attributes {dimension_semantics = [#tpu.dimension_semantics<arbitrary>, #tpu.dimension_semantics<arbitrary>], iteration_bounds = array<i64: 4, 1>, scalar_prefetch = 0 : i64, scratch_operands = 2 : i64, tpu.core_type = #tpu.core_type<tc>, window_params = [{transform_indices = @transform_0, window_bounds = array<i64: 128, 128>}, {pipeline_mode = #tpu.pipeline_mode<synchronous>, transform_indices = @transform_1, window_bounds = array<i64: 128, 128>}, {pipeline_mode = #tpu.pipeline_mode<synchronous>, transform_indices = @transform_2, window_bounds = array<i64: 4, 128, 128>}, {pipeline_mode = #tpu.pipeline_mode<synchronous>, transform_indices = @transform_3, window_bounds = array<i64: 4, 1, 128>}, {transform_indices = @transform_4, window_bounds = array<i64: 128, 128>}]} {
    %c0_i32 = arith.constant 0 : i32
    %0 = arith.cmpi eq, %arg1, %c0_i32 : i32
    %1 = arith.extui %0 : i1 to i32
    %c0_i32_0 = arith.constant 0 : i32
    %2 = arith.cmpi ne, %1, %c0_i32_0 : i32
    scf.if %2 {
      %17 = arith.index_cast %arg0 : i32 to index
      %c0_9 = arith.constant 0 : index
      %c0_10 = arith.constant 0 : index
      %18 = vector.load %arg4[%17, %c0_9, %c0_10] : memref<4x128x128xbf16, #tpu.memory_space<vmem>>, vector<1x128x128xbf16>
      %19 = vector.shape_cast %18 : vector<1x128x128xbf16> to vector<128x128xbf16>
      %c0_i32_11 = arith.constant 0 : i32
      %20 = arith.cmpi eq, %arg0, %c0_i32_11 : i32
      %21 = arith.extui %20 : i1 to i32
      %c0_i32_12 = arith.constant 0 : i32
      %22 = arith.cmpi ne, %21, %c0_i32_12 : i32
      scf.if %22 {
        %c0_15 = arith.constant 0 : index
        %c0_16 = arith.constant 0 : index
        %26 = vector.load %arg3[%c0_15, %c0_16] : memref<128x128xbf16, #tpu.memory_space<vmem>>, vector<128x128xbf16>
        %cst_17 = arith.constant dense<0.000000e+00> : vector<128x128xf32>
        %27 = tpu.matmul %26, %19, %cst_17 {dimension_numbers = #tpu.dot_dimension_numbers<[1], [0], [0], [1], [0, 0, 1, 1], [], []>} : vector<128x128xbf16>, vector<128x128xbf16>, vector<128x128xf32> -> vector<128x128xf32>
        %28 = arith.truncf %27 : vector<128x128xf32> to vector<128x128xbf16>
        %c0_18 = arith.constant 0 : index
        %c0_19 = arith.constant 0 : index
        %29 = vector.load %arg8[%c0_18, %c0_19] : memref<128x128xbf16, #tpu.memory_space<vmem>>, vector<128x128xbf16>
        tpu.vector_store %arg8[%c0_18, %c0_19], %28 {strides = array<i32>} : memref<128x128xbf16, #tpu.memory_space<vmem>>, vector<128x128xbf16>,
      } else {
      }
      %c0_i32_13 = arith.constant 0 : i32
      %23 = arith.cmpi sgt, %arg0, %c0_i32_13 : i32
      %24 = arith.extui %23 : i1 to i32
      %c0_i32_14 = arith.constant 0 : i32
      %25 = arith.cmpi ne, %24, %c0_i32_14 : i32
      scf.if %25 {
        %c0_15 = arith.constant 0 : index
        %c0_16 = arith.constant 0 : index
        %26 = vector.load %arg7[%c0_15, %c0_16] : memref<128x128xbf16, #tpu.memory_space<vmem>>, vector<128x128xbf16>
        %cst_17 = arith.constant dense<0.000000e+00> : vector<128x128xf32>
        %27 = tpu.matmul %26, %19, %cst_17 {dimension_numbers = #tpu.dot_dimension_numbers<[1], [0], [0], [1], [0, 0, 1, 1], [], []>} : vector<128x128xbf16>, vector<128x128xbf16>, vector<128x128xf32> -> vector<128x128xf32>
        %28 = arith.truncf %27 : vector<128x128xf32> to vector<128x128xbf16>
        %c0_18 = arith.constant 0 : index
        %c0_19 = arith.constant 0 : index
        %29 = vector.load %arg8[%c0_18, %c0_19] : memref<128x128xbf16, #tpu.memory_space<vmem>>, vector<128x128xbf16>
        tpu.vector_store %arg8[%c0_18, %c0_19], %28 {strides = array<i32>} : memref<128x128xbf16, #tpu.memory_space<vmem>>, vector<128x128xbf16>,
      } else {
      }
    } else {
    }
    %c0 = arith.constant 0 : index
    %c0_1 = arith.constant 0 : index
    %3 = vector.load %arg2[%c0, %c0_1] : memref<128x128xbf16, #tpu.memory_space<vmem>>, vector<128x128xbf16>
    %c0_2 = arith.constant 0 : index
    %c0_3 = arith.constant 0 : index
    %4 = vector.load %arg8[%c0_2, %c0_3] : memref<128x128xbf16, #tpu.memory_space<vmem>>, vector<128x128xbf16>
    %cst = arith.constant dense<0.000000e+00> : vector<128x128xf32>
    %5 = tpu.matmul %3, %4, %cst {dimension_numbers = #tpu.dot_dimension_numbers<[1], [0], [0], [1], [0, 0, 1, 1], [], []>} : vector<128x128xbf16>, vector<128x128xbf16>, vector<128x128xf32> -> vector<128x128xf32>
    %6 = arith.index_cast %arg0 : i32 to index
    %c0_4 = arith.constant 0 : index
    %c0_5 = arith.constant 0 : index
    %7 = vector.load %arg5[%6, %c0_4, %c0_5] : memref<4x1x128xf32, #tpu.memory_space<vmem>>, vector<1x1x128xf32>
    %8 = vector.shape_cast %7 : vector<1x1x128xf32> to vector<1x128xf32>
    %9 = vector.broadcast %8 : vector<1x128xf32> to vector<128x128xf32>
    %10 = arith.addf %5, %9 : vector<128x128xf32>
    %c3_i32 = arith.constant 3 : i32
    %11 = arith.cmpi slt, %arg0, %c3_i32 : i32
    %12 = arith.extui %11 : i1 to i32
    %c0_i32_6 = arith.constant 0 : i32
    %13 = arith.cmpi ne, %12, %c0_i32_6 : i32
    scf.if %13 {
      %c128_i32 = arith.constant 128 : i32
      %17 = arith.muli %arg1, %c128_i32 : i32
      %18 = tpu.assume_multiple %17, 128 : i32
      %cst_9 = arith.constant 5.000000e-01 : f32
      %19 = vector.broadcast %cst_9 : f32 to vector<128x128xf32>
      %20 = arith.mulf %19, %10 : vector<128x128xf32>
      %cst_10 = arith.constant 4.471500e-02 : f32
      %21 = vector.broadcast %cst_10 : f32 to vector<128x128xf32>
      %22 = arith.mulf %21, %10 : vector<128x128xf32>
      %23 = arith.mulf %22, %10 : vector<128x128xf32>
      %24 = arith.mulf %23, %10 : vector<128x128xf32>
      %25 = arith.addf %10, %24 : vector<128x128xf32>
      %cst_11 = arith.constant 0.797884583 : f32
      %26 = vector.broadcast %cst_11 : f32 to vector<128x128xf32>
      %27 = arith.mulf %26, %25 : vector<128x128xf32>
      %28 = math.tanh %27 : vector<128x128xf32>
      %cst_12 = arith.constant 1.000000e+00 : f32
      %29 = vector.broadcast %cst_12 : f32 to vector<128x128xf32>
      %30 = arith.addf %29, %28 : vector<128x128xf32>
      %31 = arith.mulf %20, %30 : vector<128x128xf32>
      %32 = arith.truncf %31 : vector<128x128xf32> to vector<128x128xbf16>
      %33 = arith.index_cast %18 : i32 to index
      %c0_13 = arith.constant 0 : index
      %34 = vector.load %arg7[%33, %c0_13] : memref<128x128xbf16, #tpu.memory_space<vmem>>, vector<128x128xbf16>
      tpu.vector_store %arg7[%33, %c0_13], %32 {strides = array<i32>} : memref<128x128xbf16, #tpu.memory_space<vmem>>, vector<128x128xbf16>,
    } else {
    }
    %c3_i32_7 = arith.constant 3 : i32
    %14 = arith.cmpi eq, %arg0, %c3_i32_7 : i32
    %15 = arith.extui %14 : i1 to i32
    %c0_i32_8 = arith.constant 0 : i32
    %16 = arith.cmpi ne, %15, %c0_i32_8 : i32
    scf.if %16 {
      %cst_9 = arith.constant dense<0xFF800000> : vector<128xf32>
      %17 = vector.multi_reduction <maximumf>, %10, %cst_9 [1] : vector<128x128xf32> to vector<128xf32>
      %18 = vector.shape_cast %17 : vector<128xf32> to vector<128x1xf32>
      %19 = vector.broadcast %18 : vector<128x1xf32> to vector<128x128xf32>
      %20 = arith.subf %10, %19 : vector<128x128xf32>
      %21 = math.exp %20 : vector<128x128xf32>
      %cst_10 = arith.constant dense<0.000000e+00> : vector<128xf32>
      %22 = vector.multi_reduction <add>, %21, %cst_10 [1] : vector<128x128xf32> to vector<128xf32>
      %23 = vector.shape_cast %22 : vector<128xf32> to vector<128x1xf32>
      %24 = math.log %23 : vector<128x1xf32>
      %25 = vector.broadcast %24 : vector<128x1xf32> to vector<128x128xf32>
      %26 = arith.subf %20, %25 : vector<128x128xf32>
      %c0_11 = arith.constant 0 : index
      %c0_12 = arith.constant 0 : index
      %27 = vector.load %arg6[%c0_11, %c0_12] : memref<128x128xf32, #tpu.memory_space<vmem>>, vector<128x128xf32>
      tpu.vector_store %arg6[%c0_11, %c0_12], %26 {strides = array<i32>} : memref<128x128xf32, #tpu.memory_space<vmem>>, vector<128x128xf32>,
    } else {
    }
    return
  }
  func.func @transform_0(%arg0: i32, %arg1: i32) -> (i32, i32) {
    %c0_i32 = arith.constant 0 : i32
    %c0_i32_0 = arith.constant 0 : i32
    return %arg1, %c0_i32 : i32, i32
  }
  func.func @transform_1(%arg0: i32, %arg1: i32) -> (i32, i32) {
    %c0_i32 = arith.constant 0 : i32
    %c0_i32_0 = arith.constant 0 : i32
    %c0_i32_1 = arith.constant 0 : i32
    return %c0_i32, %c0_i32_0 : i32, i32
  }
  func.func @transform_2(%arg0: i32, %arg1: i32) -> (i32, i32, i32) {
    %c0_i32 = arith.constant 0 : i32
    %c0_i32_0 = arith.constant 0 : i32
    %c0_i32_1 = arith.constant 0 : i32
    %c0_i32_2 = arith.constant 0 : i32
    return %c0_i32, %c0_i32_0, %c0_i32_1 : i32, i32, i32
  }
  func.func @transform_3(%arg0: i32, %arg1: i32) -> (i32, i32, i32) {
    %c0_i32 = arith.constant 0 : i32
    %c0_i32_0 = arith.constant 0 : i32
    %c0_i32_1 = arith.constant 0 : i32
    %c0_i32_2 = arith.constant 0 : i32
    return %c0_i32, %c0_i32_0, %c0_i32_1 : i32, i32, i32
  }
  func.func @transform_4(%arg0: i32, %arg1: i32) -> (i32, i32) {
    %c3_i32 = arith.constant 3 : i32
    %0 = arith.cmpi eq, %arg0, %c3_i32 : i32
    %c0_i32 = arith.constant 0 : i32
    %1 = arith.select %0, %arg1, %c0_i32 : i32
    %c0_i32_0 = arith.constant 0 : i32
    %c0_i32_1 = arith.constant 0 : i32
    return %1, %c0_i32_0 : i32, i32
  }
}

</mosaic_0001>

<bundles_post_ra>
// kernel: tpu_custom_call.1
= control target key start
LH: loop header
LB: loop body
LE: loop exit
PB: predicated region body
PF: predicated region fallthrough
CT: control target
= control target key end

     0   :  { %9 = vsyncpa [#allocation5], 0  ;;  %s2362_s0 = inlined_call_operand.hbm [shape: bf16[128,128], index: 0, kind: input, shape index: {}]   ;;  %s2363_s1 = inlined_call_operand.hbm [shape: bf16[128,128], index: 1, kind: input, shape index: {}]   ;;  %s2364_s2 = inlined_call_operand.hbm [shape: bf16[4,128,128], index: 2, kind: input, shape index: {}]   ;;  %s2365_s3 = inlined_call_operand.vmem [shape: f32[4,1,128], index: 3, kind: input, shape index: {}]   ;;  %s2366_s4 = inlined_call_operand.hbm [shape: f32[128,128], index: 4, kind: output, shape index: {}]  }
   0x1   :  { %10 = vsyncpa [#allocation8], 0 }
   0x2   :  { %11 = vsyncpa [#allocation6], 0 }
   0x3   :  { %13 = vsyncpa [#allocation6 + $0x1], 0  ;;  %s1920_s15 = smov 0   ;;  %s1922_s16 = smov 0  }
   0x4   :  { %s1924_s17 = smov 0  }
   0x5 LB: > { %s1312_s18 = sadd.s32 4294967295, %s1885_s17   ;;  %s1313_s19 = sadd.s32 4294967294, %s1885_s17   ;;  %s1885_s17 = sphi %s1924_s17, %s19_s17   ;;  %s1881_s16 = sphi %s1922_s16, %s2380_s16   ;;  %s1877_s15 = sphi %s1920_s15, %s2379_s15  }
   0x6   : > { %p1314_p0 = scmp.ge.s32.totalorder %s1885_s17, 1  ;;  %p155_p1 = scmp.lt.s32.totalorder %s1885_s17, 5 }
   0x7   : > { %p1941_p2 = scmp.eq.s32.totalorder %s1312_s18, 0  ;;  %s1887_s22 = smov [#allocation7]  }
   0x8   : > { %p1945_p3 = pnand %p1314_p0, %p155_p1  ;;  %s183_s23 = sshll.u32 %s1887_s22, 4  ;;  %s184_s23 = int_to_ptr.vmem [resolvable:$true] %s183_s23 }
   0x9   : > { %s2370_s20 = scalar_select %p1941_p2, 1, 0 }
   0xa   : > { %s2371_s21 = scalar_select %p1945_p3, 1, 0 }
   0xb   : > { %p1574_p4 = pneg %p1945_p3  ;;  %s31_s25 = sadd.s32 1, %s1881_s16 }
   0xc   : > { %p1958_p6 = scmp.ge.s32.totalorder %s31_s25, 4  ;;  %s1741_s29 = scalar_lea.hbm %s2363_s1, 1024 }
   0xd   : > { %p1953_p5 = pnand %p1941_p2, %p1574_p4  ;;  %p1742_p7 = scmp.ne.s32.totalorder %s2363_s1, %s1741_s29 }
   0xe   : > { %s2373_s26 = scalar_select %p1958_p6, 1, 0 }
   0xf   : > { %p1970_p8 = pneg %p1953_p5  ;;  %p1748_p11 = scmp.lt.u32.totalorder %s1741_s29, %s2363_s1 }
  0x11   : > { %p1744_p9 = pnand %p1970_p8, %p1742_p7 }
  0x13   : > { %p1745_p10 = pneg %p1744_p9 }
  0x15   : > { %p1750_p12 = pnand %p1748_p11, %p1745_p10 }
  0x17   : > { %1753 = shalt.err (!%p1750_p12)
}
  0x18   : > { %s1754_s9 = scalar_lea.vmem %s184_s23, 1024  ;;  %p1762_p4 = scmp.lt.s32.totalorder %s184_s23, %s184_s23 }
  0x19   : > { %p1755_p13 = scmp.ne.s32.totalorder %s184_s23, %s1754_s9  ;;  %p1763_p2 = scmp.lt.s32.totalorder %s1754_s9, %s1754_s9 }
  0x1b   : > { %p1757_p0 = pnand %p1755_p13, %p1970_p8  ;;  %p1764_p3 = por %p1763_p2, %p1762_p4 }
  0x1d   : > { %p1758_p1 = pneg %p1757_p0 }
  0x1f   : > { %p1765_p6 = pnand %p1764_p3, %p1758_p1 }
  0x21   : > { %1768 = shalt.err (!%p1765_p6)
}
  0x22   : > { %s1888_s10 = smov 64   ;;  %s1889_s11 = smov 4  }
  0x23   : > { %1580 = dma.hbm_to_vmem [thread:$0]  (!%p1953_p5), %s2363_s1, 1024, %s184_s23, [#allocation8], %s1888_s10, %s1888_s10, %s1889_s11  }
  0x24   : > { %p2375_p7 = scmp.ne.s32.totalorder %s2373_s26, 0  ;;  %s1890_s14 = smov [#allocation4]  }
  0x25   : > { %s170_s22 = sshll.u32 %s1890_s14, 4  ;;  %s1891_s27 = smov [#allocation9]   ;;  %s171_s22 = int_to_ptr.vmem [resolvable:$true] %s170_s22 }
  0x26   : > { %s2382_s25 = smov (%p2375_p7, %s31_s25), 0  ;;  %s196_s28 = sshll.u32 %s1891_s27, 4  ;;  %s197_s28 = int_to_ptr.vmem [resolvable:$true] %s196_s28 }
  0x27   : > { %s1769_s5 = scalar_lea.hbm %s2362_s0, 1024 }
  0x28   : > { %p1770_p2 = scmp.ne.s32.totalorder %s2362_s0, %s1769_s5  ;;  %p1776_p9 = scmp.lt.u32.totalorder %s1769_s5, %s2362_s0 }
  0x2a   : > { %p1772_p3 = pnand %p1770_p2, %p1970_p8 }
  0x2c   : > { %p1773_p6 = pneg %p1772_p3 }
  0x2e   : > { %p1778_p10 = pnand %p1776_p9, %p1773_p6 }
  0x30   : > { %1781 = shalt.err (!%p1778_p10)
}
  0x31   : > { %s1782_s9 = scalar_lea.vmem %s171_s22, 1024  ;;  %p1790_p0 = scmp.lt.s32.totalorder %s171_s22, %s171_s22 }
  0x32   : > { %p1783_p11 = scmp.ne.s32.totalorder %s171_s22, %s1782_s9  ;;  %p1791_p1 = scmp.lt.s32.totalorder %s1782_s9, %s1782_s9 }
  0x34   : > { %p1785_p12 = pnand %p1783_p11, %p1970_p8  ;;  %p1792_p4 = por %p1791_p1, %p1790_p0 }
  0x36   : > { %p1786_p13 = pneg %p1785_p12 }
  0x38   : > { %p1793_p7 = pnand %p1792_p4, %p1786_p13 }
  0x3a   : > { %1796 = shalt.err (!%p1793_p7)
}
  0x3b   : > { %1577 = dma.hbm_to_vmem [thread:$0]  (!%p1953_p5), %s2362_s0, 1024, %s171_s22, [#allocation5], %s1888_s10, %s1888_s10, %s1889_s11  }
  0x3c   : > { %s1797_s29 = scalar_lea.hbm %s2364_s2, 4096 }
  0x3d   : > { %p1798_p2 = scmp.ne.s32.totalorder %s2364_s2, %s1797_s29  ;;  %p1804_p9 = scmp.lt.u32.totalorder %s1797_s29, %s2364_s2 }
  0x3f   : > { %p1800_p3 = pnand %p1798_p2, %p1970_p8 }
  0x41   : > { %p1801_p6 = pneg %p1800_p3 }
  0x43   : > { %p1806_p10 = pnand %p1804_p9, %p1801_p6 }
  0x45   : > { %1809 = shalt.err (!%p1806_p10)
}
  0x46   : > { %s1810_s23 = scalar_lea.vmem %s197_s28, 4096  ;;  %p1818_p0 = scmp.lt.s32.totalorder %s197_s28, %s197_s28 }
  0x47   : > { %p1811_p11 = scmp.ne.s32.totalorder %s197_s28, %s1810_s23  ;;  %p1819_p1 = scmp.lt.s32.totalorder %s1810_s23, %s1810_s23 }
  0x49   : > { %p1813_p12 = pnand %p1811_p11, %p1970_p8  ;;  %p1820_p4 = por %p1819_p1, %p1818_p0 }
  0x4b   : > { %p1814_p13 = pneg %p1813_p12 }
  0x4d   : > { %p1821_p7 = pnand %p1820_p4, %p1814_p13 }
  0x4f   : > { %1824 = shalt.err (!%p1821_p7)
}
  0x50   : > { %1583 = dma.hbm_to_vmem [thread:$0]  (!%p1953_p5), %s2364_s2, 4096, %s197_s28, [#allocation8], %s1888_s10, %s1888_s10, %s1889_s11  }
  0x51   : > { %p2376_p2 = scmp.ne.s32.totalorder %s2371_s21, 0 }
  0x52   : > { %p2377_p8 = scmp.ne.s32.totalorder (!%p2376_p2), %s2370_s20, 0 }
  0x53   : > { %215 = sbr.rel (%p2376_p2) target bundleno = 1295 (0x50f), region = 36 }
  0x5a   : > { %1864 = dma.done.wait (%p2377_p8), [#allocation5], 1024  }
  0x5b   : > { %1866 = vsyncadd (%p2377_p8), [#allocation5], 4294966272 }
  0x5c   : > { %1868 = dma.done.wait (%p2377_p8), [#allocation8], 5120  }
  0x5d   : > { %1870 = vsyncadd (%p2377_p8), [#allocation8], 4294962176  ;;  %s1365_s24 = sshll.u32 %s1877_s15, 6  ;;  %p1324_p5 = scmp.ne.s32.totalorder %s1877_s15, 0 }
  0x5e   : > { %s255_s6 = scalar_lea.vmem [#allocation9], %s1365_s24  ;;  %v1629_v18 = vld [vmem:[#allocation7] sm:$0xff] (!%p1324_p5)   ;;  %v1631_v26 = vld [vmem:[#allocation7 + $0x8] sm:$0xff] (!%p1324_p5)   ;;  %v1633_v28 = vld [vmem:[#allocation7 + $0x10] sm:$0xff] (!%p1324_p5)  }
  0x5f   : > { %v2046_v0 = vld [vmem:[%s255_s6] sm:$0xf]  ;;  %v2048_v1 = vld [vmem:[%s255_s6 + $0x4] sm:$0xf]  ;;  %v2050_v2 = vld [vmem:[%s255_s6 + $0x8] sm:$0xf]  ;;  %1430 = vmatprep.mubr.bf16.mxu0 (!%p1324_p5), %v1629_v18 }
  0x60   : > { %v2052_v3 = vld [vmem:[%s255_s6 + $0xc] sm:$0xf]  ;;  %v2054_v4 = vld [vmem:[%s255_s6 + $0x10] sm:$0xf]  ;;  %v2056_v5 = vld [vmem:[%s255_s6 + $0x14] sm:$0xf]  ;;  %v1333_v16 = vcombine.low (!%p1324_p5), %v2046_v0, %v2048_v1 }
  0x61   : > { %v2058_v6 = vld [vmem:[%s255_s6 + $0x18] sm:$0xf]  ;;  %v2060_v7 = vld [vmem:[%s255_s6 + $0x1c] sm:$0xf]  ;;  %v2062_v8 = vld [vmem:[%s255_s6 + $0x20] sm:$0xf]  ;;  %v1334_v17 = vcombine.low (!%p1324_p5), %v2050_v2, %v2052_v3  ;;  %v1335_v20 = vcombine.low (!%p1324_p5), %v2054_v4, %v2056_v5 }
  0x62   : > { %v2064_v9 = vld [vmem:[%s255_s6 + $0x24] sm:$0xf]  ;;  %v2066_v10 = vld [vmem:[%s255_s6 + $0x28] sm:$0xf]  ;;  %v2068_v11 = vld [vmem:[%s255_s6 + $0x2c] sm:$0xf]  ;;  %1414 = vmatprep.subr.bf16.mxu0 (!%p1324_p5), %v1333_v16  ;;  %1510 = vmatprep.subr.bf16.mxu1 (!%p1324_p5), %v1333_v16  ;;  %v1336_v21 = vcombine.low (!%p1324_p5), %v2058_v6, %v2060_v7 }
  0x63   : > { %v2070_v12 = vld [vmem:[%s255_s6 + $0x30] sm:$0xf]  ;;  %v2072_v13 = vld [vmem:[%s255_s6 + $0x34] sm:$0xf]  ;;  %v2074_v14 = vld [vmem:[%s255_s6 + $0x38] sm:$0xf]  ;;  %1415 = vmatpush3.bf16.msra.mxu0 (!%p1324_p5), %v1333_v16  ;;  %1518 = vmatpush3.bf16.msra.mxu1 (!%p1324_p5), %v1333_v16  ;;  %v1337_v22 = vcombine.low (!%p1324_p5), %v2062_v8, %v2064_v9  ;;  %v1338_v23 = vcombine.low (!%p1324_p5), %v2066_v10, %v2068_v11 }
  0x64   : > { %v2076_v15 = vld [vmem:[%s255_s6 + $0x3c] sm:$0xf]  ;;  %275 = sbr.rel (%p1324_p5) target bundleno = 356 (0x164), region = 56  ;;  %v1630_v19 = vld [vmem:[#allocation7 + $0x20] sm:$0xff] (!%p1324_p5)   ;;  %1416 = vmatprep.subr.bf16.mxu0 (!%p1324_p5), %v1334_v17  ;;  %1511 = vmatprep.subr.bf16.mxu1 (!%p1324_p5), %v1334_v17  ;;  %v1339_v24 = vcombine.low (!%p1324_p5), %v2070_v12, %v2072_v13  ;;  %v1632_v27 = vld [vmem:[#allocation7 + $0x28] sm:$0xff] (!%p1324_p5)  }
  0x65   : > { %1438 = vmatprep.mubr.bf16.mxu1 (!%p1324_p5), %v1630_v19  ;;  %v1340_v25 = vcombine.low (!%p1324_p5), %v2074_v14, %v2076_v15  ;;  %v1634_v29 = vld [vmem:[#allocation7 + $0x30] sm:$0xff] (!%p1324_p5)   ;;  %v1635_v30 = vld [vmem:[#allocation7 + $0x18] sm:$0xff] (!%p1324_p5)  }
  0x66   : > { %v1636_v31 = vld [vmem:[#allocation7 + $0x38] sm:$0xff] (!%p1324_p5)  }
  0x67   : > { %1417 = vmatpush3.bf16.msra.mxu0 (!%p1324_p5), %v1334_v17  ;;  %1519 = vmatpush3.bf16.msra.mxu1 (!%p1324_p5), %v1334_v17 }
  0x68   : > { %1418 = vmatprep.subr.bf16.mxu0 (!%p1324_p5), %v1335_v20  ;;  %1512 = vmatprep.subr.bf16.mxu1 (!%p1324_p5), %v1335_v20 }
  0x6b   : > { %1419 = vmatpush3.bf16.msra.mxu0 %v1335_v20  ;;  %1520 = vmatpush3.bf16.msra.mxu1 %v1335_v20 }
  0x6c   : > { %1420 = vmatprep.subr.bf16.mxu0 %v1336_v21  ;;  %1513 = vmatprep.subr.bf16.mxu1 %v1336_v21 }
  0x6f   : > { %1421 = vmatpush3.bf16.msra.mxu0 %v1336_v21  ;;  %1521 = vmatpush3.bf16.msra.mxu1 %v1336_v21 }
  0x70   : > { %1422 = vmatprep.subr.bf16.mxu0 %v1337_v22  ;;  %1514 = vmatprep.subr.bf16.mxu1 %v1337_v22 }
  0x73   : > { %1423 = vmatpush3.bf16.msra.mxu0 %v1337_v22  ;;  %1522 = vmatpush3.bf16.msra.mxu1 %v1337_v22 }
  0x74   : > { %1424 = vmatprep.subr.bf16.mxu0 %v1338_v23  ;;  %1515 = vmatprep.subr.bf16.mxu1 %v1338_v23 }
  0x77   : > { %1425 = vmatpush3.bf16.msra.mxu0 %v1338_v23  ;;  %1523 = vmatpush3.bf16.msra.mxu1 %v1338_v23 }
  0x78   : > { %1426 = vmatprep.subr.bf16.mxu0 %v1339_v24  ;;  %1516 = vmatprep.subr.bf16.mxu1 %v1339_v24 }
  0x7b   : > { %1427 = vmatpush3.bf16.msra.mxu0 %v1339_v24  ;;  %1524 = vmatpush3.bf16.msra.mxu1 %v1339_v24 }
  0x7c   : > { %1428 = vmatprep.subr.bf16.mxu0 %v1340_v25  ;;  %1517 = vmatprep.subr.bf16.mxu1 %v1340_v25 }
  0x7f   : > { %1429 = vmatpush3.bf16.msra.mxu0 %v1340_v25  ;;  %1525 = vmatpush3.bf16.msra.mxu1 %v1340_v25 }
  0x82   : > { %1431 = vmatmul.mubr.bf16.vlgmr.msra.gmra.mrb[0].mxu0 %v1631_v26  ;;  %1439 = vmatmul.mubr.bf16.vlgmr.msra.gmra.mrb[0].mxu1 %v1632_v27 }
  0x83   : > { %1434 = vmatprep.mubr.bf16.mxu0 %v1633_v28  ;;  %1442 = vmatprep.mubr.bf16.mxu1 %v1634_v29 }
  0x8a   : > { %1435 = vmatmul.mubr.bf16.gmra.mrb[4].mxu0 %v1635_v30  ;;  %1443 = vmatmul.mubr.bf16.gmra.mrb[4].mxu1 %v1636_v31 }
 0x155   : > { %v1432_v32 = vpop.f32.mrb[0].mxu0  ;;  %v1440_v33 = vpop.f32.mrb[0].mxu1 }
 0x156   : > { %v422_v34 = vpop.f32.mrb[1].mxu0  ;;  %v454_v35 = vpop.f32.mrb[1].mxu1 }
 0x157   : > { %v1433_v36 = vpop.f32.mrb[2].mxu0  ;;  %v1441_v37 = vpop.f32.mrb[2].mxu1 }
 0x158   : > { %v486_v38 = vpack.c.bf16 %v1433_v36, %v1432_v32  ;;  %v490_v39 = vpack.c.bf16 %v1441_v37, %v1440_v33  ;;  %v425_v40 = vpop.f32.mrb[3].mxu0  ;;  %v457_v41 = vpop.f32.mrb[3].mxu1 }
 0x159   : > { %v485_v42 = vpack.c.bf16 %v425_v40, %v422_v34  ;;  %v489_v43 = vpack.c.bf16 %v457_v41, %v454_v35 }
 0x15a   : > { %494 = vst [vmem:[#allocation3 + $0x8] sm:$0xff] %v486_v38  ;;  %498 = vst [vmem:[#allocation3 + $0x28] sm:$0xff] %v490_v39 }
 0x15b   : > { %493 = vst [vmem:[#allocation3] sm:$0xff] %v485_v42  ;;  %497 = vst [vmem:[#allocation3 + $0x20] sm:$0xff] %v489_v43 }
 0x15d   : > { %v1436_v44 = vpop.f32.mrb[4].mxu0  ;;  %v1444_v45 = vpop.f32.mrb[4].mxu1 }
 0x15e   : > { %v438_v46 = vpop.f32.mrb[5].mxu0  ;;  %v470_v47 = vpop.f32.mrb[5].mxu1 }
 0x15f   : > { %v1437_v48 = vpop.f32.mrb[6].mxu0  ;;  %v1445_v49 = vpop.f32.mrb[6].mxu1 }
 0x160   : > { %v488_v50 = vpack.c.bf16 %v1437_v48, %v1436_v44  ;;  %v492_v51 = vpack.c.bf16 %v1445_v49, %v1444_v45  ;;  %v441_v52 = vpop.f32.mrb[7].mxu0  ;;  %v473_v53 = vpop.f32.mrb[7].mxu1 }
 0x161   : > { %v487_v54 = vpack.c.bf16 %v441_v52, %v438_v46  ;;  %v491_v55 = vpack.c.bf16 %v473_v53, %v470_v47 }
 0x162   : > { %496 = vst [vmem:[#allocation3 + $0x18] sm:$0xff] %v488_v50  ;;  %500 = vst [vmem:[#allocation3 + $0x38] sm:$0xff] %v492_v51 }
 0x163   : > { %495 = vst [vmem:[#allocation3 + $0x10] sm:$0xff] %v487_v54  ;;  %499 = vst [vmem:[#allocation3 + $0x30] sm:$0xff] %v491_v55 }
 0x164 PF: > { %p1341_p3 = scmp.le.s32.totalorder %s1877_s15, 0 }
 0x165   : > { %v1342_v56 = vcombine.low (!%p1341_p3), %v2046_v0, %v2048_v1  ;;  %v1343_v57 = vcombine.low (!%p1341_p3), %v2050_v2, %v2052_v3  ;;  %v505_v58 = vld [vmem:[#allocation2] sm:$0xff] (!%p1341_p3)  ;;  %v1344_v60 = vcombine.low (!%p1341_p3), %v2054_v4, %v2056_v5  ;;  %v1345_v61 = vcombine.low (!%p1341_p3), %v2058_v6, %v2060_v7  ;;  %v506_v2 = vld [vmem:[#allocation2 + $0x8] sm:$0xff] (!%p1341_p3)  ;;  %v507_v4 = vld [vmem:[#allocation2 + $0x10] sm:$0xff] (!%p1341_p3) }
 0x166   : > { %504 = sbr.rel (%p1341_p3) target bundleno = 617 (0x269), region = 60  ;;  %1462 = vmatprep.mubr.bf16.mxu0 (!%p1341_p3), %v505_v58  ;;  %v509_v59 = vld [vmem:[#allocation2 + $0x20] sm:$0xff] (!%p1341_p3)  ;;  %v1346_v62 = vcombine.low (!%p1341_p3), %v2062_v8, %v2064_v9  ;;  %v1347_v63 = vcombine.low (!%p1341_p3), %v2066_v10, %v2068_v11  ;;  %v1348_v0 = vcombine.low (!%p1341_p3), %v2070_v12, %v2072_v13  ;;  %v1349_v1 = vcombine.low (!%p1341_p3), %v2074_v14, %v2076_v15  ;;  %v510_v3 = vld [vmem:[#allocation2 + $0x28] sm:$0xff] (!%p1341_p3)  ;;  %v511_v5 = vld [vmem:[#allocation2 + $0x30] sm:$0xff] (!%p1341_p3) }
 0x167   : > { %1446 = vmatprep.subr.bf16.mxu0 (!%p1341_p3), %v1342_v56  ;;  %1526 = vmatprep.subr.bf16.mxu1 (!%p1341_p3), %v1342_v56  ;;  %v508_v6 = vld [vmem:[#allocation2 + $0x18] sm:$0xff] (!%p1341_p3) }
 0x168   : > { %1447 = vmatpush3.bf16.msra.mxu0 (!%p1341_p3), %v1342_v56  ;;  %1534 = vmatpush3.bf16.msra.mxu1 (!%p1341_p3), %v1342_v56  ;;  %v512_v7 = vld [vmem:[#allocation2 + $0x38] sm:$0xff] (!%p1341_p3) }
 0x169   : > { %1448 = vmatprep.subr.bf16.mxu0 (!%p1341_p3), %v1343_v57  ;;  %1527 = vmatprep.subr.bf16.mxu1 (!%p1341_p3), %v1343_v57 }
 0x16a   : > { %1470 = vmatprep.mubr.bf16.mxu1 (!%p1341_p3), %v509_v59 }
 0x16c   : > { %1449 = vmatpush3.bf16.msra.mxu0 (!%p1341_p3), %v1343_v57  ;;  %1535 = vmatpush3.bf16.msra.mxu1 (!%p1341_p3), %v1343_v57 }
 0x16d   : > { %1450 = vmatprep.subr.bf16.mxu0 %v1344_v60  ;;  %1528 = vmatprep.subr.bf16.mxu1 %v1344_v60 }
 0x170   : > { %1451 = vmatpush3.bf16.msra.mxu0 %v1344_v60  ;;  %1536 = vmatpush3.bf16.msra.mxu1 %v1344_v60 }
 0x171   : > { %1452 = vmatprep.subr.bf16.mxu0 %v1345_v61  ;;  %1529 = vmatprep.subr.bf16.mxu1 %v1345_v61 }
 0x174   : > { %1453 = vmatpush3.bf16.msra.mxu0 %v1345_v61  ;;  %1537 = vmatpush3.bf16.msra.mxu1 %v1345_v61 }
 0x175   : > { %1454 = vmatprep.subr.bf16.mxu0 %v1346_v62  ;;  %1530 = vmatprep.subr.bf16.mxu1 %v1346_v62 }
 0x178   : > { %1455 = vmatpush3.bf16.msra.mxu0 %v1346_v62  ;;  %1538 = vmatpush3.bf16.msra.mxu1 %v1346_v62 }
 0x179   : > { %1456 = vmatprep.subr.bf16.mxu0 %v1347_v63  ;;  %1531 = vmatprep.subr.bf16.mxu1 %v1347_v63 }
 0x17c   : > { %1457 = vmatpush3.bf16.msra.mxu0 %v1347_v63  ;;  %1539 = vmatpush3.bf16.msra.mxu1 %v1347_v63 }
 0x17d   : > { %1458 = vmatprep.subr.bf16.mxu0 %v1348_v0  ;;  %1532 = vmatprep.subr.bf16.mxu1 %v1348_v0 }
 0x180   : > { %1459 = vmatpush3.bf16.msra.mxu0 %v1348_v0  ;;  %1540 = vmatpush3.bf16.msra.mxu1 %v1348_v0 }
 0x181   : > { %1460 = vmatprep.subr.bf16.mxu0 %v1349_v1  ;;  %1533 = vmatprep.subr.bf16.mxu1 %v1349_v1 }
 0x184   : > { %1461 = vmatpush3.bf16.msra.mxu0 %v1349_v1  ;;  %1541 = vmatpush3.bf16.msra.mxu1 %v1349_v1 }
 0x187   : > { %1463 = vmatmul.mubr.bf16.vlgmr.msra.gmra.mrb[0].mxu0 %v506_v2  ;;  %1471 = vmatmul.mubr.bf16.vlgmr.msra.gmra.mrb[0].mxu1 %v510_v3 }
 0x188   : > { %1466 = vmatprep.mubr.bf16.mxu0 %v507_v4  ;;  %1474 = vmatprep.mubr.bf16.mxu1 %v511_v5 }
 0x18f   : > { %1467 = vmatmul.mubr.bf16.gmra.mrb[4].mxu0 %v508_v6  ;;  %1475 = vmatmul.mubr.bf16.gmra.mrb[4].mxu1 %v512_v7 }
 0x25a   : > { %v1464_v8 = vpop.f32.mrb[0].mxu0  ;;  %v1472_v9 = vpop.f32.mrb[0].mxu1 }
 0x25b   : > { %v595_v10 = vpop.f32.mrb[1].mxu0  ;;  %v627_v11 = vpop.f32.mrb[1].mxu1 }
 0x25c   : > { %v1465_v12 = vpop.f32.mrb[2].mxu0  ;;  %v1473_v13 = vpop.f32.mrb[2].mxu1 }
 0x25d   : > { %v659_v14 = vpack.c.bf16 %v1465_v12, %v1464_v8  ;;  %v663_v15 = vpack.c.bf16 %v1473_v13, %v1472_v9  ;;  %v598_v16 = vpop.f32.mrb[3].mxu0  ;;  %v630_v17 = vpop.f32.mrb[3].mxu1 }
 0x25e   : > { %v658_v18 = vpack.c.bf16 %v598_v16, %v595_v10  ;;  %v662_v19 = vpack.c.bf16 %v630_v17, %v627_v11 }
 0x25f   : > { %667 = vst [vmem:[#allocation3 + $0x8] sm:$0xff] %v659_v14  ;;  %671 = vst [vmem:[#allocation3 + $0x28] sm:$0xff] %v663_v15 }
 0x260   : > { %666 = vst [vmem:[#allocation3] sm:$0xff] %v658_v18  ;;  %670 = vst [vmem:[#allocation3 + $0x20] sm:$0xff] %v662_v19 }
 0x262   : > { %v1468_v20 = vpop.f32.mrb[4].mxu0  ;;  %v1476_v21 = vpop.f32.mrb[4].mxu1 }
 0x263   : > { %v611_v22 = vpop.f32.mrb[5].mxu0  ;;  %v643_v23 = vpop.f32.mrb[5].mxu1 }
 0x264   : > { %v1469_v24 = vpop.f32.mrb[6].mxu0  ;;  %v1477_v25 = vpop.f32.mrb[6].mxu1 }
 0x265   : > { %v661_v26 = vpack.c.bf16 %v1469_v24, %v1468_v20  ;;  %v665_v27 = vpack.c.bf16 %v1477_v25, %v1476_v21  ;;  %v614_v28 = vpop.f32.mrb[7].mxu0  ;;  %v646_v29 = vpop.f32.mrb[7].mxu1 }
 0x266   : > { %v660_v30 = vpack.c.bf16 %v614_v28, %v611_v22  ;;  %v664_v31 = vpack.c.bf16 %v646_v29, %v643_v23 }
 0x267   : > { %669 = vst [vmem:[#allocation3 + $0x18] sm:$0xff] %v661_v26  ;;  %673 = vst [vmem:[#allocation3 + $0x38] sm:$0xff] %v665_v27 }
 0x268   : > { %668 = vst [vmem:[#allocation3 + $0x10] sm:$0xff] %v660_v30  ;;  %672 = vst [vmem:[#allocation3 + $0x30] sm:$0xff] %v664_v31 }
 0x269 PF: > { %v690_v32 = vld [vmem:[#allocation3] sm:$0xff]  ;;  %v691_v33 = vld [vmem:[#allocation3 + $0x8] sm:$0xff]  ;;  %v1641_v44 = vld [vmem:[#allocation4 + $0x10] sm:$0xff]   ;;  %s698_s10 = scalar_lea.vmem %s2365_s3, %s1877_s15  ;;  %p1359_p6 = scmp.ge.s32.totalorder %s1877_s15, 3 }
 0x26a   : > { %1478 = vmatprep.subr.bf16.mxu0 %v690_v32  ;;  %1542 = vmatprep.subr.bf16.mxu1 %v690_v32  ;;  %v1637_v35 = vld [vmem:[#allocation4] sm:$0xff]   ;;  %v695_v39 = vld [vmem:[#allocation3 + $0x28] sm:$0xff]  ;;  %v1642_v45 = vld [vmem:[#allocation4 + $0x30] sm:$0xff]  }
 0x26b   : > { %1479 = vmatpush3.bf16.msra.mxu0 %v690_v32  ;;  %1550 = vmatpush3.bf16.msra.mxu1 %v690_v32  ;;  %v1638_v36 = vld [vmem:[#allocation4 + $0x20] sm:$0xff]   ;;  %v1639_v42 = vld [vmem:[#allocation4 + $0x8] sm:$0xff]   ;;  %v1643_v46 = vld [vmem:[#allocation4 + $0x18] sm:$0xff]  }
 0x26c   : > { %1480 = vmatprep.subr.bf16.mxu0 %v691_v33  ;;  %1543 = vmatprep.subr.bf16.mxu1 %v691_v33  ;;  %v694_v38 = vld [vmem:[#allocation3 + $0x20] sm:$0xff]  ;;  %v1640_v43 = vld [vmem:[#allocation4 + $0x28] sm:$0xff]   ;;  %v1644_v47 = vld [vmem:[#allocation4 + $0x38] sm:$0xff]  }
 0x26d   : > { %1494 = vmatprep.mubr.bf16.mxu0 %v1637_v35  ;;  %1502 = vmatprep.mubr.bf16.mxu1 %v1638_v36  ;;  %v1350_v48 = vld [vmem:[%s698_s10] ss:$0 sm:$0xff] }
 0x26e   : > { %v693_v37 = vld [vmem:[#allocation3 + $0x18] sm:$0xff] }
 0x26f   : > { %v692_v34 = vld [vmem:[#allocation3 + $0x10] sm:$0xff]  ;;  %1481 = vmatpush3.bf16.msra.mxu0 %v691_v33  ;;  %1551 = vmatpush3.bf16.msra.mxu1 %v691_v33  ;;  %v697_v41 = vld [vmem:[#allocation3 + $0x38] sm:$0xff] }
 0x270   : > { %1482 = vmatprep.subr.bf16.mxu0 %v692_v34  ;;  %1544 = vmatprep.subr.bf16.mxu1 %v692_v34  ;;  %v696_v40 = vld [vmem:[#allocation3 + $0x30] sm:$0xff] }
 0x273   : > { %1483 = vmatpush3.bf16.msra.mxu0 %v692_v34  ;;  %1552 = vmatpush3.bf16.msra.mxu1 %v692_v34 }
 0x274   : > { %1484 = vmatprep.subr.bf16.mxu0 %v693_v37  ;;  %1545 = vmatprep.subr.bf16.mxu1 %v693_v37 }
 0x277   : > { %1485 = vmatpush3.bf16.msra.mxu0 %v693_v37  ;;  %1553 = vmatpush3.bf16.msra.mxu1 %v693_v37 }
 0x278   : > { %1486 = vmatprep.subr.bf16.mxu0 %v694_v38  ;;  %1546 = vmatprep.subr.bf16.mxu1 %v694_v38 }
 0x27b   : > { %1487 = vmatpush3.bf16.msra.mxu0 %v694_v38  ;;  %1554 = vmatpush3.bf16.msra.mxu1 %v694_v38 }
 0x27c   : > { %1488 = vmatprep.subr.bf16.mxu0 %v695_v39  ;;  %1547 = vmatprep.subr.bf16.mxu1 %v695_v39 }
 0x27f   : > { %1489 = vmatpush3.bf16.msra.mxu0 %v695_v39  ;;  %1555 = vmatpush3.bf16.msra.mxu1 %v695_v39 }
 0x280   : > { %1490 = vmatprep.subr.bf16.mxu0 %v696_v40  ;;  %1548 = vmatprep.subr.bf16.mxu1 %v696_v40 }
 0x283   : > { %1491 = vmatpush3.bf16.msra.mxu0 %v696_v40  ;;  %1556 = vmatpush3.bf16.msra.mxu1 %v696_v40 }
 0x284   : > { %1492 = vmatprep.subr.bf16.mxu0 %v697_v41  ;;  %1549 = vmatprep.subr.bf16.mxu1 %v697_v41 }
 0x287   : > { %1493 = vmatpush3.bf16.msra.mxu0 %v697_v41  ;;  %1557 = vmatpush3.bf16.msra.mxu1 %v697_v41 }
 0x28a   : > { %1495 = vmatmul.mubr.bf16.vlgmr.msra.gmra.mrb[0].mxu0 %v1639_v42  ;;  %1503 = vmatmul.mubr.bf16.vlgmr.msra.gmra.mrb[0].mxu1 %v1640_v43 }
 0x28b   : > { %1498 = vmatprep.mubr.bf16.mxu0 %v1641_v44  ;;  %1506 = vmatprep.mubr.bf16.mxu1 %v1642_v45 }
 0x292   : > { %1499 = vmatmul.mubr.bf16.gmra.mrb[4].mxu0 %v1643_v46  ;;  %1507 = vmatmul.mubr.bf16.gmra.mrb[4].mxu1 %v1644_v47 }
 0x35d   : > { %v1496_v49 = vpop.f32.mrb[0].mxu0  ;;  %v1504_v50 = vpop.f32.mrb[0].mxu1 }
 0x35e   : > { %v2116_v51 = vadd.f32 %v1496_v49, %v1350_v48  ;;  %v2118_v52 = vadd.f32 %v1504_v50, %v1350_v48  ;;  %v788_v53 = vpop.f32.mrb[1].mxu0  ;;  %v820_v54 = vpop.f32.mrb[1].mxu1 }
 0x35f   : > { %v2120_v55 = vadd.f32 %v1350_v48, %v788_v53  ;;  %v2122_v56 = vadd.f32 %v1350_v48, %v820_v54  ;;  %v1497_v57 = vpop.f32.mrb[2].mxu0  ;;  %v1505_v58 = vpop.f32.mrb[2].mxu1 }
 0x360   : > { %v2124_v59 = vadd.f32 %v1497_v57, %v1350_v48  ;;  %v2126_v60 = vadd.f32 %v1505_v58, %v1350_v48  ;;  %v791_v61 = vpop.f32.mrb[3].mxu0  ;;  %v823_v62 = vpop.f32.mrb[3].mxu1  ;;  %v874_v19 = vmul.f32 (!%p1359_p6), 0.044715, %v2116_v51 }
 0x361   : > { %v2128_v63 = vadd.f32 %v1350_v48, %v791_v61  ;;  %v2130_v0 = vadd.f32 %v1350_v48, %v823_v62  ;;  %v872_v17 = vmul.f32 (!%p1359_p6), 0.044715, %v2120_v55  ;;  %v856_v49 = vmul.f32 (!%p1359_p6), 0.5, %v2120_v55 }
 0x362   : > { %v875_v20 = vmul.f32 (!%p1359_p6), 0.044715, %v2124_v59  ;;  %v890_v23 = vmul.f32 (!%p1359_p6), %v874_v19, %v2116_v51 }
 0x363   : > { %854 = sbr.rel (%p1359_p6) target bundleno = 923 (0x39b), region = 64  ;;  %v873_v18 = vmul.f32 (!%p1359_p6), 0.044715, %v2128_v63  ;;  %v888_v21 = vmul.f32 (!%p1359_p6), %v872_v17, %v2120_v55  ;;  %v857_v54 = vmul.f32 (!%p1359_p6), 0.5, %v2128_v63  ;;  %v882_v17 = vmul.f32 (!%p1359_p6), 0.044715, %v2118_v52 }
 0x364   : > { %v891_v24 = vmul.f32 (!%p1359_p6), %v875_v20, %v2124_v59  ;;  %v906_v29 = vmul.f32 (!%p1359_p6), %v890_v23, %v2116_v51 }
 0x365   : > { %v1500_v1 = vpop.f32.mrb[4].mxu0  ;;  %v1508_v2 = vpop.f32.mrb[4].mxu1  ;;  %v889_v22 = vmul.f32 (!%p1359_p6), %v873_v18, %v2128_v63  ;;  %v904_v27 = vmul.f32 (!%p1359_p6), %v888_v21, %v2120_v55  ;;  %v883_v18 = vmul.f32 (!%p1359_p6), 0.044715, %v2126_v60  ;;  %v898_v23 = vmul.f32 (!%p1359_p6), %v882_v17, %v2118_v52 }
 0x366   : > { %v2132_v3 = vadd.f32 %v1500_v1, %v1350_v48  ;;  %v2134_v4 = vadd.f32 %v1508_v2, %v1350_v48  ;;  %v804_v5 = vpop.f32.mrb[5].mxu0  ;;  %v836_v6 = vpop.f32.mrb[5].mxu1  ;;  %v907_v30 = vmul.f32 (!%p1359_p6), %v891_v24, %v2124_v59  ;;  %v922_v37 = vadd.f32 (!%p1359_p6), %v906_v29, %v2116_v51 }
 0x367   : > { %v2136_v7 = vadd.f32 %v1350_v48, %v804_v5  ;;  %v2138_v8 = vadd.f32 %v1350_v48, %v836_v6  ;;  %v1501_v9 = vpop.f32.mrb[6].mxu0  ;;  %v1509_v10 = vpop.f32.mrb[6].mxu1  ;;  %v905_v28 = vmul.f32 (!%p1359_p6), %v889_v22, %v2128_v63  ;;  %v920_v33 = vadd.f32 (!%p1359_p6), %v904_v27, %v2120_v55 }
 0x368   : > { %v2140_v11 = vadd.f32 %v1501_v9, %v1350_v48  ;;  %v2142_v12 = vadd.f32 %v1509_v10, %v1350_v48  ;;  %v807_v13 = vpop.f32.mrb[7].mxu0  ;;  %v839_v14 = vpop.f32.mrb[7].mxu1  ;;  %v878_v35 = vmul.f32 (!%p1359_p6), 0.044715, %v2132_v3  ;;  %v923_v38 = vadd.f32 (!%p1359_p6), %v907_v30, %v2124_v59 }
 0x369   : > { %v2144_v15 = vadd.f32 %v1350_v48, %v807_v13  ;;  %v2146_v16 = vadd.f32 %v1350_v48, %v839_v14  ;;  %v876_v25 = vmul.f32 (!%p1359_p6), 0.044715, %v2136_v7  ;;  %v921_v34 = vadd.f32 (!%p1359_p6), %v905_v28, %v2128_v63 }
 0x36a   : > { %v879_v36 = vmul.f32 0.044715, %v2140_v11  ;;  %v936_v41 = vmul.f32 0.7978846, %v920_v33  ;;  %v894_v43 = vmul.f32 %v878_v35, %v2132_v3  ;;  %v938_v45 = vmul.f32 0.7978846, %v922_v37 }
 0x36b   : > { %v877_v26 = vmul.f32 0.044715, %v2144_v15  ;;  %v892_v31 = vmul.f32 %v876_v25, %v2136_v7  ;;  %v937_v42 = vmul.f32 0.7978846, %v921_v34  ;;  %v939_v46 = vmul.f32 0.7978846, %v923_v38 }
 0x36c   : > { %v895_v44 = vmul.f32 %v879_v36, %v2140_v11  ;;  %1645 = vtanh.f32 %v936_v41  ;;  %v910_v50 = vmul.f32 %v894_v43, %v2132_v3  ;;  %v880_v1 = vmul.f32 0.044715, %v2122_v56 }
 0x36d   : > { %v893_v32 = vmul.f32 %v877_v26, %v2144_v15  ;;  %v908_v39 = vmul.f32 %v892_v31, %v2136_v7  ;;  %1647 = vtanh.f32 %v937_v42  ;;  %v858_v2 = vmul.f32 0.5, %v2116_v51 }
 0x36e   : > { %v911_v53 = vmul.f32 %v895_v44, %v2140_v11  ;;  %1649 = vtanh.f32 %v938_v45  ;;  %v926_v61 = vadd.f32 %v910_v50, %v2132_v3  ;;  %v859_v5 = vmul.f32 0.5, %v2124_v59 }
 0x36f   : > { %v909_v40 = vmul.f32 %v893_v32, %v2144_v15  ;;  %v924_v47 = vadd.f32 %v908_v39, %v2136_v7  ;;  %1651 = vtanh.f32 %v939_v46  ;;  %v881_v6 = vmul.f32 0.044715, %v2130_v0 }
 0x370   : > { %v927_v62 = vadd.f32 %v911_v53, %v2140_v11  ;;  %v942_v9 = vmul.f32 0.7978846, %v926_v61  ;;  %v896_v13 = vmul.f32 %v880_v1, %v2122_v56  ;;  %v860_v19 = vmul.f32 0.5, %v2136_v7 }
 0x371   : > { %v925_v48 = vadd.f32 %v909_v40, %v2144_v15  ;;  %v940_v57 = vmul.f32 0.7978846, %v924_v47  ;;  %v897_v14 = vmul.f32 %v881_v6, %v2130_v0  ;;  %v861_v20 = vmul.f32 0.5, %v2144_v15 }
 0x372   : > { %v943_v10 = vmul.f32 0.7978846, %v927_v62  ;;  %v912_v21 = vmul.f32 %v896_v13, %v2122_v56  ;;  %v899_v24 = vmul.f32 %v883_v18, %v2126_v60  ;;  %v862_v25 = vmul.f32 0.5, %v2132_v3 }
 0x373   : > { %v941_v58 = vmul.f32 0.7978846, %v925_v48  ;;  %1653 = vtanh.f32 %v940_v57  ;;  %v913_v22 = vmul.f32 %v897_v14, %v2130_v0  ;;  %v884_v27 = vmul.f32 0.044715, %v2138_v8 }
 0x374   : > { %v928_v26 = vadd.f32 %v912_v21, %v2122_v56  ;;  %v885_v28 = vmul.f32 0.044715, %v2146_v16  ;;  %v863_v29 = vmul.f32 0.5, %v2140_v11  ;;  %v914_v31 = vmul.f32 %v898_v23, %v2118_v52 }
 0x375   : > { %1655 = vtanh.f32 %v941_v58  ;;  %v929_v30 = vadd.f32 %v913_v22, %v2130_v0  ;;  %v915_v32 = vmul.f32 %v899_v24, %v2126_v60  ;;  %v900_v35 = vmul.f32 %v884_v27, %v2138_v8 }
 0x376   : > { %1657 = vtanh.f32 %v942_v9  ;;  %v1646_v33 = vpop.eup %1645  ;;  %v944_v34 = vmul.f32 0.7978846, %v928_v26  ;;  %v901_v36 = vmul.f32 %v885_v28, %v2146_v16  ;;  %v886_v37 = vmul.f32 0.044715, %v2134_v4 }
 0x377   : > { %1659 = vtanh.f32 %v943_v10  ;;  %v1648_v38 = vpop.eup %1647  ;;  %v968_v39 = vadd.f32 1.0, %v1646_v33  ;;  %v945_v40 = vmul.f32 0.7978846, %v929_v30  ;;  %v930_v41 = vadd.f32 %v914_v31, %v2118_v52 }
 0x378   : > { %v931_v42 = vadd.f32 %v915_v32, %v2126_v60  ;;  %v1650_v43 = vpop.eup %1649  ;;  %v969_v44 = vadd.f32 1.0, %v1648_v38  ;;  %1661 = vtanh.f32 %v944_v34  ;;  %v916_v45 = vmul.f32 %v900_v35, %v2138_v8 }
 0x379   : > { %v917_v46 = vmul.f32 %v901_v36, %v2146_v16  ;;  %v1652_v47 = vpop.eup %1651  ;;  %v984_v48 = vmul.f32 %v968_v39, %v856_v49  ;;  %v970_v50 = vadd.f32 1.0, %v1650_v43  ;;  %1663 = vtanh.f32 %v945_v40 }
 0x37a   : > { %v946_v53 = vmul.f32 0.7978846, %v930_v41  ;;  %v985_v58 = vmul.f32 %v969_v44, %v857_v54  ;;  %v971_v61 = vadd.f32 1.0, %v1652_v47  ;;  %v947_v62 = vmul.f32 0.7978846, %v931_v42 }
 0x37b   : > { %v932_v1 = vadd.f32 %v916_v45, %v2138_v8  ;;  %v986_v9 = vmul.f32 %v970_v50, %v858_v2  ;;  %v933_v13 = vadd.f32 %v917_v46, %v2146_v16  ;;  %v887_v2 = vmul.f32 0.044715, %v2142_v12 }
 0x37c   : > { %1665 = vtanh.f32 %v946_v53  ;;  %v1000_v17 = vpack.c.bf16 %v985_v58, %v984_v48  ;;  %v987_v18 = vmul.f32 %v971_v61, %v859_v5  ;;  %v902_v31 = vmul.f32 %v886_v37, %v2134_v4 }
 0x37d   : > { %v1654_v57 = vpop.eup %1653  ;;  %1667 = vtanh.f32 %v947_v62  ;;  %v948_v24 = vmul.f32 0.7978846, %v932_v1  ;;  %v949_v54 = vmul.f32 0.7978846, %v933_v13  ;;  %v903_v33 = vmul.f32 %v887_v2, %v2142_v12 }
 0x37e   : > { %v972_v10 = vadd.f32 1.0, %v1654_v57  ;;  %1012 = vst [vmem:[#allocation2] sm:$0xff] %v1000_v17  ;;  %v1001_v26 = vpack.c.bf16 %v987_v18, %v986_v9  ;;  %v918_v34 = vmul.f32 %v902_v31, %v2134_v4  ;;  %v865_v36 = vmul.f32 0.5, %v2130_v0 }
 0x37f   : > { %v1656_v6 = vpop.eup %1655  ;;  %1669 = vtanh.f32 %v948_v24  ;;  %v866_v40 = vmul.f32 0.5, %v2118_v52  ;;  %v867_v44 = vmul.f32 0.5, %v2126_v60  ;;  %v868_v61 = vmul.f32 0.5, %v2138_v8 }
 0x380   : > { %v1658_v14 = vpop.eup %1657  ;;  %v973_v21 = vadd.f32 1.0, %v1656_v6  ;;  %v988_v22 = vmul.f32 %v972_v10, %v860_v19  ;;  %1013 = vst [vmem:[#allocation2 + $0x8] sm:$0xff] %v1001_v26  ;;  %1671 = vtanh.f32 %v949_v54  ;;  %v864_v19 = vmul.f32 0.5, %v2122_v56 }
 0x381   : > { %v1660_v49 = vpop.eup %1659  ;;  %v974_v23 = vadd.f32 1.0, %v1658_v14  ;;  %v934_v37 = vadd.f32 %v918_v34, %v2134_v4  ;;  %v869_v6 = vmul.f32 0.5, %v2146_v16 }
 0x382   : > { %v989_v27 = vmul.f32 %v973_v21, %v861_v20  ;;  %v975_v28 = vadd.f32 1.0, %v1660_v49  ;;  %v1662_v35 = vpop.eup %1661  ;;  %v870_v49 = vmul.f32 0.5, %v2134_v4 }
 0x383   : > { %v990_v30 = vmul.f32 %v974_v23, %v862_v25  ;;  %v919_v25 = vmul.f32 %v903_v33, %v2142_v12  ;;  %v1664_v38 = vpop.eup %1663  ;;  %v976_v39 = vadd.f32 1.0, %v1662_v35  ;;  %v950_v45 = vmul.f32 0.7978846, %v934_v37 }
 0x384   : > { %v1002_v32 = vpack.c.bf16 %v989_v27, %v988_v22  ;;  %v991_v5 = vmul.f32 %v975_v28, %v863_v29  ;;  %v977_v29 = vadd.f32 1.0, %v1664_v38  ;;  %v871_v23 = vmul.f32 0.5, %v2142_v12 }
 0x385   : > { %v935_v41 = vadd.f32 %v919_v25, %v2142_v12  ;;  %v992_v43 = vmul.f32 %v976_v39, %v864_v19  ;;  %1673 = vtanh.f32 %v950_v45 }
 0x386   : > { %1014 = vst [vmem:[#allocation2 + $0x10] sm:$0xff] %v1002_v32  ;;  %v1003_v20 = vpack.c.bf16 %v991_v5, %v990_v30  ;;  %v1666_v42 = vpop.eup %1665  ;;  %v993_v47 = vmul.f32 %v977_v29, %v865_v36 }
 0x387   : > { %v1668_v46 = vpop.eup %1667  ;;  %v978_v48 = vadd.f32 1.0, %v1666_v42  ;;  %v951_v50 = vmul.f32 0.7978846, %v935_v41 }
 0x388   : > { %1015 = vst [vmem:[#allocation2 + $0x18] sm:$0xff] %v1003_v20  ;;  %v979_v53 = vadd.f32 1.0, %v1668_v46  ;;  %v1004_v57 = vpack.c.bf16 %v993_v47, %v992_v43 }
 0x389   : > { %v994_v58 = vmul.f32 %v978_v48, %v866_v40  ;;  %1675 = vtanh.f32 %v951_v50  ;;  %v1670_v62 = vpop.eup %1669 }
 0x38a   : > { %v995_v1 = vmul.f32 %v979_v53, %v867_v44  ;;  %v1672_v9 = vpop.eup %1671  ;;  %1016 = vst [vmem:[#allocation2 + $0x20] sm:$0xff] %v1004_v57  ;;  %v980_v10 = vadd.f32 1.0, %v1670_v62 }
 0x38b   : > { %v981_v14 = vadd.f32 1.0, %v1672_v9 }
 0x38c   : > { %v1005_v13 = vpack.c.bf16 %v995_v1, %v994_v58  ;;  %v996_v17 = vmul.f32 %v980_v10, %v868_v61 }
 0x38d   : > { %v997_v18 = vmul.f32 %v981_v14, %v869_v6 }
 0x38e   : > { %1017 = vst [vmem:[#allocation2 + $0x28] sm:$0xff] %v1005_v13 }
 0x38f   : > { %v1006_v21 = vpack.c.bf16 %v997_v18, %v996_v17  ;;  %v1674_v22 = vpop.eup %1673 }
 0x390   : > { %v982_v54 = vadd.f32 1.0, %v1674_v22 }
 0x391   : > { %1018 = vst [vmem:[#allocation2 + $0x30] sm:$0xff] %v1006_v21 }
 0x392   : > { %v998_v27 = vmul.f32 %v982_v54, %v870_v49 }
 0x393   : > { %v1676_v24 = vpop.eup %1675 }
 0x394   : > { %v983_v26 = vadd.f32 1.0, %v1676_v24 }
 0x396   : > { %v999_v28 = vmul.f32 %v983_v26, %v871_v23 }
 0x398   : > { %v1007_v2 = vpack.c.bf16 %v999_v28, %v998_v27 }
 0x39a   : > { %1019 = vst [vmem:[#allocation2 + $0x38] sm:$0xff] %v1007_v2 }
 0x39b PF: > { %p1360_p9 = scmp.ne.s32.totalorder %s1877_s15, 3 }
 0x39c   : > { %1024 = vmax.xlane.f32.xlu0 (!%p1360_p9), %v2120_v55  ;;  %1028 = vmax.xlane.f32.xlu1 (!%p1360_p9), %v2116_v51 }
 0x39d   : > { %1023 = sbr.rel (%p1360_p9) target bundleno = 1271 (0x4f7), region = 68 }
 0x3a0   : > { %1026 = vmax.xlane.f32.xlu0 (!%p1360_p9), %v2128_v63  ;;  %1030 = vmax.xlane.f32.xlu1 (!%p1360_p9), %v2124_v59 }
 0x3a4   : > { %1032 = vmax.xlane.f32.xlu0 %v2136_v7  ;;  %1034 = vmax.xlane.f32.xlu1 %v2144_v15 }
 0x3a8   : > { %1036 = vmax.xlane.f32.xlu0 %v2132_v3  ;;  %1038 = vmax.xlane.f32.xlu1 %v2140_v11 }
 0x3ac   : > { %1040 = vmax.xlane.f32.xlu0 %v2122_v56  ;;  %1042 = vmax.xlane.f32.xlu1 %v2130_v0 }
 0x3b0   : > { %1044 = vmax.xlane.f32.xlu0 %v2118_v52  ;;  %1046 = vmax.xlane.f32.xlu1 %v2126_v60 }
 0x3b4   : > { %1048 = vmax.xlane.f32.xlu0 %v2138_v8  ;;  %1050 = vmax.xlane.f32.xlu1 %v2146_v16 }
 0x3b8   : > { %1052 = vmax.xlane.f32.xlu0 %v2134_v4  ;;  %1054 = vmax.xlane.f32.xlu1 %v2142_v12 }
 0x429   : > { %v1025_v30 = vpop.xlane.xlu0 %1024  ;;  %v1029_v31 = vpop.xlane.xlu1 %1028 }
 0x42a   : > { %v2247_v32 = vsub.f32 %v2120_v55, %v1025_v30  ;;  %v2250_v5 = vsub.f32 %v2116_v51, %v1029_v31 }
 0x42c   : > { %v1072_v33 = vmul.f32 1.442695, %v2247_v32  ;;  %v1076_v19 = vmul.f32 1.442695, %v2250_v5 }
 0x42d   : > { %v1027_v34 = vpop.xlane.xlu0 %1026  ;;  %v1031_v35 = vpop.xlane.xlu1 %1030 }
 0x42e   : > { %1677 = vpow2.f32 %v1072_v33  ;;  %v2255_v20 = vsub.f32 %v2128_v63, %v1027_v34  ;;  %v2258_v36 = vsub.f32 %v2124_v59, %v1031_v35 }
 0x42f   : > { %1679 = vpow2.f32 %v1076_v19 }
 0x430   : > { %v1074_v55 = vmul.f32 1.442695, %v2255_v20  ;;  %v1078_v25 = vmul.f32 1.442695, %v2258_v36 }
 0x431   : > { %v1033_v51 = vpop.xlane.xlu0 %1032  ;;  %v1035_v38 = vpop.xlane.xlu1 %1034 }
 0x432   : > { %1681 = vpow2.f32 %v1074_v55  ;;  %v2263_v39 = vsub.f32 %v2136_v7, %v1033_v51  ;;  %v2266_v37 = vsub.f32 %v2144_v15, %v1035_v38 }
 0x433   : > { %1683 = vpow2.f32 %v1078_v25 }
 0x434   : > { %v1080_v63 = vmul.f32 1.442695, %v2263_v39  ;;  %v1082_v59 = vmul.f32 1.442695, %v2266_v37 }
 0x435   : > { %v1037_v29 = vpop.xlane.xlu0 %1036  ;;  %v1039_v40 = vpop.xlane.xlu1 %1038 }
 0x436   : > { %1685 = vpow2.f32 %v1080_v63  ;;  %v2271_v41 = vsub.f32 %v2132_v3, %v1037_v29  ;;  %v2274_v42 = vsub.f32 %v2140_v11, %v1039_v40 }
 0x437   : > { %1687 = vpow2.f32 %v1082_v59 }
 0x438   : > { %v1678_v43 = vpop.eup %1677  ;;  %v1084_v7 = vmul.f32 1.442695, %v2271_v41  ;;  %v1086_v15 = vmul.f32 1.442695, %v2274_v42 }
 0x439   : > { %1104 = vadd.xlane.f32.xlu0 %v1678_v43  ;;  %v1041_v44 = vpop.xlane.xlu0 %1040  ;;  %v1043_v45 = vpop.xlane.xlu1 %1042 }
 0x43a   : > { %v1680_v46 = vpop.eup %1679  ;;  %1689 = vpow2.f32 %v1084_v7  ;;  %v2279_v47 = vsub.f32 %v2122_v56, %v1041_v44  ;;  %v2282_v3 = vsub.f32 %v2130_v0, %v1043_v45 }
 0x43b   : > { %1691 = vpow2.f32 %v1086_v15 }
 0x43c   : > { %v1682_v48 = vpop.eup %1681  ;;  %v1088_v11 = vmul.f32 1.442695, %v2279_v47  ;;  %v1090_v50 = vmul.f32 1.442695, %v2282_v3 }
 0x43d   : > { %1108 = vadd.xlane.f32.xlu0 %v1680_v46  ;;  %1106 = vadd.xlane.f32.xlu1 %v1682_v48  ;;  %v1045_v53 = vpop.xlane.xlu0 %1044  ;;  %v1047_v57 = vpop.xlane.xlu1 %1046 }
 0x43e   : > { %v1684_v58 = vpop.eup %1683  ;;  %1693 = vpow2.f32 %v1088_v11  ;;  %v2287_v61 = vsub.f32 %v2118_v52, %v1045_v53  ;;  %v2290_v56 = vsub.f32 %v2126_v60, %v1047_v57 }
 0x43f   : > { %1695 = vpow2.f32 %v1090_v50 }
 0x440   : > { %v1686_v0 = vpop.eup %1685  ;;  %v1092_v62 = vmul.f32 1.442695, %v2287_v61  ;;  %v1094_v1 = vmul.f32 1.442695, %v2290_v56 }
 0x441   : > { %1110 = vadd.xlane.f32.xlu1 %v1684_v58  ;;  %1112 = vadd.xlane.f32.xlu0 %v1686_v0  ;;  %v1049_v6 = vpop.xlane.xlu0 %1048  ;;  %v1051_v9 = vpop.xlane.xlu1 %1050 }
 0x442   : > { %v1688_v10 = vpop.eup %1687  ;;  %1697 = vpow2.f32 %v1092_v62  ;;  %v2295_v13 = vsub.f32 %v2138_v8, %v1049_v6  ;;  %v2298_v52 = vsub.f32 %v2146_v16, %v1051_v9 }
 0x443   : > { %1699 = vpow2.f32 %v1094_v1 }
 0x444   : > { %v1690_v60 = vpop.eup %1689  ;;  %v1096_v14 = vmul.f32 1.442695, %v2295_v13  ;;  %v1098_v17 = vmul.f32 1.442695, %v2298_v52 }
 0x445   : > { %1114 = vadd.xlane.f32.xlu1 %v1688_v10  ;;  %1116 = vadd.xlane.f32.xlu0 %v1690_v60  ;;  %v1053_v18 = vpop.xlane.xlu0 %1052  ;;  %v1055_v21 = vpop.xlane.xlu1 %1054 }
 0x446   : > { %v1692_v49 = vpop.eup %1691  ;;  %1701 = vpow2.f32 %v1096_v14  ;;  %v2303_v22 = vsub.f32 %v2134_v4, %v1053_v18  ;;  %v2306_v8 = vsub.f32 %v2142_v12, %v1055_v21 }
 0x447   : > { %1703 = vpow2.f32 %v1098_v17 }
 0x448   : > { %v1694_v16 = vpop.eup %1693  ;;  %v1100_v23 = vmul.f32 1.442695, %v2303_v22  ;;  %v1102_v24 = vmul.f32 1.442695, %v2306_v8 }
 0x449   : > { %1118 = vadd.xlane.f32.xlu1 %v1692_v49  ;;  %1120 = vadd.xlane.f32.xlu0 %v1694_v16  ;;  %v1696_v54 = vpop.eup %1695 }
 0x44a   : > { %1705 = vpow2.f32 %v1100_v23 }
 0x44b   : > { %1707 = vpow2.f32 %v1102_v24 }
 0x44c   : > { %v1698_v26 = vpop.eup %1697 }
 0x44d   : > { %1122 = vadd.xlane.f32.xlu1 %v1696_v54  ;;  %1124 = vadd.xlane.f32.xlu0 %v1698_v26  ;;  %v1700_v27 = vpop.eup %1699 }
 0x450   : > { %v1702_v4 = vpop.eup %1701 }
 0x451   : > { %1126 = vadd.xlane.f32.xlu1 %v1700_v27  ;;  %1128 = vadd.xlane.f32.xlu0 %v1702_v4  ;;  %v1704_v12 = vpop.eup %1703 }
 0x454   : > { %v1706_v28 = vpop.eup %1705 }
 0x455   : > { %1130 = vadd.xlane.f32.xlu1 %v1704_v12  ;;  %1132 = vadd.xlane.f32.xlu0 %v1706_v28  ;;  %v1708_v2 = vpop.eup %1707 }
 0x459   : > { %1134 = vadd.xlane.f32.xlu1 %v1708_v2 }
 0x4c6   : > { %v1105_v30 = vpop.xlane.xlu0 %1104 }
 0x4c7   : > { %1709 = vlog2.f32 %v1105_v30 }
 0x4ca   : > { %v1107_v31 = vpop.xlane.xlu1 %1106  ;;  %v1109_v33 = vpop.xlane.xlu0 %1108 }
 0x4cb   : > { %1711 = vlog2.f32 %v1107_v31 }
 0x4cc   : > { %1713 = vlog2.f32 %v1109_v33 }
 0x4ce   : > { %v1111_v19 = vpop.xlane.xlu1 %1110  ;;  %v1113_v34 = vpop.xlane.xlu0 %1112 }
 0x4cf   : > { %1715 = vlog2.f32 %v1111_v19 }
 0x4d0   : > { %1717 = vlog2.f32 %v1113_v34 }
 0x4d1   : > { %v1710_v35 = vpop.eup %1709 }
 0x4d2   : > { %v1137_v55 = vmul.f32 0.6931472, %v1710_v35  ;;  %v1115_v25 = vpop.xlane.xlu1 %1114  ;;  %v1117_v51 = vpop.xlane.xlu0 %1116 }
 0x4d3   : > { %1719 = vlog2.f32 %v1115_v25 }
 0x4d4   : > { %v1168_v38 = vsub.f32 %v2247_v32, %v1137_v55  ;;  %1721 = vlog2.f32 %v1117_v51 }
 0x4d5   : > { %v1712_v63 = vpop.eup %1711 }
 0x4d6   : > { %v1714_v59 = vpop.eup %1713  ;;  %1184 = vst [vmem:[#allocation10] sm:$0xff] %v1168_v38  ;;  %v1139_v29 = vmul.f32 0.6931472, %v1712_v63  ;;  %v1119_v40 = vpop.xlane.xlu1 %1118 }
 0x4d7   : > { %v1121_v43 = vpop.xlane.xlu0 %1120  ;;  %v1141_v7 = vmul.f32 0.6931472, %v1714_v59  ;;  %1723 = vlog2.f32 %v1119_v40 }
 0x4d8   : > { %v1169_v15 = vsub.f32 %v2255_v20, %v1139_v29  ;;  %1725 = vlog2.f32 %v1121_v43 }
 0x4d9   : > { %v1716_v44 = vpop.eup %1715  ;;  %v1170_v45 = vsub.f32 %v2250_v5, %v1141_v7 }
 0x4da   : > { %v1718_v46 = vpop.eup %1717  ;;  %1185 = vst [vmem:[#allocation10 + $0x8] sm:$0xff] %v1169_v15  ;;  %v1143_v48 = vmul.f32 0.6931472, %v1716_v44  ;;  %v1123_v11 = vpop.xlane.xlu1 %1122 }
 0x4db   : > { %v1125_v32 = vpop.xlane.xlu0 %1124  ;;  %1186 = vst [vmem:[#allocation10 + $0x10] sm:$0xff] %v1170_v45  ;;  %v1145_v50 = vmul.f32 0.6931472, %v1718_v46  ;;  %1727 = vlog2.f32 %v1123_v11 }
 0x4dc   : > { %v1171_v53 = vsub.f32 %v2258_v36, %v1143_v48  ;;  %1729 = vlog2.f32 %v1125_v32 }
 0x4dd   : > { %v1720_v57 = vpop.eup %1719  ;;  %v1172_v58 = vsub.f32 %v2263_v39, %v1145_v50 }
 0x4de   : > { %v1722_v0 = vpop.eup %1721  ;;  %1187 = vst [vmem:[#allocation10 + $0x18] sm:$0xff] %v1171_v53  ;;  %v1147_v20 = vmul.f32 0.6931472, %v1720_v57  ;;  %v1127_v62 = vpop.xlane.xlu1 %1126 }
 0x4df   : > { %v1129_v1 = vpop.xlane.xlu0 %1128  ;;  %1188 = vst [vmem:[#allocation10 + $0x20] sm:$0xff] %v1172_v58  ;;  %v1149_v5 = vmul.f32 0.6931472, %v1722_v0  ;;  %1731 = vlog2.f32 %v1127_v62 }
 0x4e0   : > { %v1173_v6 = vsub.f32 %v2266_v37, %v1147_v20  ;;  %1733 = vlog2.f32 %v1129_v1 }
 0x4e1   : > { %v1724_v9 = vpop.eup %1723  ;;  %v1174_v10 = vsub.f32 %v2271_v41, %v1149_v5 }
 0x4e2   : > { %v1726_v60 = vpop.eup %1725  ;;  %1189 = vst [vmem:[#allocation10 + $0x28] sm:$0xff] %v1173_v6  ;;  %v1151_v36 = vmul.f32 0.6931472, %v1724_v9  ;;  %v1131_v14 = vpop.xlane.xlu1 %1130 }
 0x4e3   : > { %v1133_v17 = vpop.xlane.xlu0 %1132  ;;  %1190 = vst [vmem:[#allocation10 + $0x30] sm:$0xff] %v1174_v10  ;;  %v1153_v39 = vmul.f32 0.6931472, %v1726_v60  ;;  %1735 = vlog2.f32 %v1131_v14 }
 0x4e4   : > { %v1175_v18 = vsub.f32 %v2274_v42, %v1151_v36  ;;  %1737 = vlog2.f32 %v1133_v17 }
 0x4e5   : > { %v1728_v21 = vpop.eup %1727  ;;  %v1176_v49 = vsub.f32 %v2279_v47, %v1153_v39 }
 0x4e6   : > { %v1730_v16 = vpop.eup %1729  ;;  %1191 = vst [vmem:[#allocation10 + $0x38] sm:$0xff] %v1175_v18  ;;  %v1155_v37 = vmul.f32 0.6931472, %v1728_v21  ;;  %v1135_v23 = vpop.xlane.xlu1 %1134 }
 0x4e7   : > { %1192 = vst [vmem:[#allocation10 + $0x40] sm:$0xff] %v1176_v49  ;;  %v1157_v41 = vmul.f32 0.6931472, %v1730_v16  ;;  %1739 = vlog2.f32 %v1135_v23 }
 0x4e8   : > { %v1177_v24 = vsub.f32 %v2282_v3, %v1155_v37 }
 0x4e9   : > { %v1732_v54 = vpop.eup %1731  ;;  %v1178_v26 = vsub.f32 %v2287_v61, %v1157_v41 }
 0x4ea   : > { %v1734_v27 = vpop.eup %1733  ;;  %1193 = vst [vmem:[#allocation10 + $0x48] sm:$0xff] %v1177_v24  ;;  %v1159_v4 = vmul.f32 0.6931472, %v1732_v54 }
 0x4eb   : > { %1194 = vst [vmem:[#allocation10 + $0x50] sm:$0xff] %v1178_v26  ;;  %v1161_v42 = vmul.f32 0.6931472, %v1734_v27 }
 0x4ec   : > { %v1179_v12 = vsub.f32 %v2290_v56, %v1159_v4 }
 0x4ed   : > { %v1736_v47 = vpop.eup %1735  ;;  %v1180_v28 = vsub.f32 %v2295_v13, %v1161_v42 }
 0x4ee   : > { %v1738_v2 = vpop.eup %1737  ;;  %1195 = vst [vmem:[#allocation10 + $0x58] sm:$0xff] %v1179_v12  ;;  %v1163_v30 = vmul.f32 0.6931472, %v1736_v47 }
 0x4ef   : > { %1196 = vst [vmem:[#allocation10 + $0x60] sm:$0xff] %v1180_v28  ;;  %v1165_v31 = vmul.f32 0.6931472, %v1738_v2 }
 0x4f0   : > { %v1181_v3 = vsub.f32 %v2298_v52, %v1163_v30 }
 0x4f1   : > { %v1740_v33 = vpop.eup %1739  ;;  %v1182_v61 = vsub.f32 %v2303_v22, %v1165_v31 }
 0x4f2   : > { %1197 = vst [vmem:[#allocation10 + $0x68] sm:$0xff] %v1181_v3  ;;  %v1167_v19 = vmul.f32 0.6931472, %v1740_v33 }
 0x4f3   : > { %1198 = vst [vmem:[#allocation10 + $0x70] sm:$0xff] %v1182_v61 }
 0x4f4   : > { %v1183_v34 = vsub.f32 %v2306_v8, %v1167_v19 }
 0x4f6   : > { %1199 = vst [vmem:[#allocation10 + $0x78] sm:$0xff] %v1183_v34 }
 0x4f7 PF: > { %p2328_p10 = scmp.eq.s32.totalorder %s1312_s18, 3  ;;  %s1892_s11 = smov [#allocation10]  }
 0x4f8   : > { %s1216_s28 = sshll.u32 %s1892_s11, 4  ;;  %s1217_s28 = int_to_ptr.vmem [resolvable:$true] %s1216_s28 }
 0x4f9   : > { %s1825_s9 = scalar_lea.vmem %s1217_s28, 2048  ;;  %s1831_s12 = scalar_lea.vmem %s1217_s28, 4096 }
 0x4fa   : > { %p1826_p11 = scmp.ne.s32.totalorder %s1217_s28, %s1825_s9  ;;  %p1832_p0 = scmp.lt.s32.totalorder %s1217_s28, %s1217_s28 }
 0x4fb   : > { %p1833_p1 = scmp.lt.s32.totalorder %s1831_s12, %s1825_s9 }
 0x4fc   : > { %p1827_p12 = pnand %p1826_p11, %p2328_p10 }
 0x4fd   : > { %p1834_p4 = por %p1833_p1, %p1832_p0 }
 0x4fe   : > { %p1828_p13 = pneg %p1827_p12 }
 0x500   : > { %p1835_p7 = pnand %p1834_p4, %p1828_p13 }
 0x502   : > { %1838 = shalt.err (!%p1835_p7)
}
 0x503   : > { %s1839_s14 = scalar_lea.hbm %s2366_s4, 2048 }
 0x504   : > { %p1840_p2 = scmp.ne.s32.totalorder %s2366_s4, %s1839_s14  ;;  %p1845_p3 = scmp.lt.u32.totalorder %s1839_s14, %s2366_s4 }
 0x506   : > { %p1841_p8 = pnand %p1840_p2, %p2328_p10 }
 0x508   : > { %p1842_p5 = pneg %p1841_p8 }
 0x50a   : > { %p1847_p6 = pnand %p1845_p3, %p1842_p5 }
 0x50c   : > { %1850 = shalt.err (!%p1847_p6)
}
 0x50d   : > { %s1893_s7 = smov 128   ;;  %s1894_s8 = smov 8  }
 0x50e   : > { %1571 = dma.vmem_to_hbm [thread:$0]  (%p2328_p10), %s1217_s28, 2048, %s2366_s4, [#allocation6], %s1893_s7, %s1893_s7, %s1894_s8  }
 0x50f PF: > { %p1595_p9 = scmp.ge.s32.totalorder %s1885_s17, 2  ;;  %p1596_p11 = scmp.eq.s32.totalorder %s1313_s19, 3 }
 0x511   : > { %p1585_p12 = pnand %p1596_p11, %p1595_p9 }
 0x513   : > { %1872 = dma.done.wait (!%p1585_p12), [#allocation6], 2048  }
 0x514   : > { %1874 = vsyncadd (!%p1585_p12), [#allocation6], 4294965248  ;;  %s19_s17 = sadd.s32 1, %s1885_s17   ;;  %s2379_s15 = smov %s1881_s16 }
 0x515   : > { %p16_p13 = scmp.ge.s32.totalorder %s19_s17, 6   ;;  %s2380_s16 = smov %s2382_s25 }
 0x517   :  { %18 = sbr.rel (!%p16_p13) target bundleno = 5 (0x5), region = 105 }
 0x51e   :  { %1237 = vsyncpa [#allocation5], 1 }
 0x51f   :  { %1239 = vsyncpa [#allocation5 + $0x1], 1 }
 0x520   :  { %1240 = vsyncpa [#allocation8], 1 }
 0x521   :  { %1241 = vsyncpa [#allocation6], 1 }
 0x522   :  { %1243 = vsyncpa [#allocation6 + $0x1], 1 }

</bundles_post_ra>
